<compile_context>
chip_gen: v7x
topology: tpu7x:2x2x1
jax: 0.10.0
libtpu: 0.0.40
codegen_flags: <defaults>
</compile_context>

<pallas_src>
import jax
import jax.numpy as jnp
from jax.experimental import pallas as pl
from jax.experimental.pallas import tpu as pltpu


LANE = 128  # TPU lane width: hidden dim padded to this for dense vregs.


def _round_up(v, m):
    return (v + m - 1) // m * m


# ---------------------------------------------------------------------------
# Kernel
# ---------------------------------------------------------------------------
def residual_fc_kernel(x_ref, w_in_ref, b_in_ref, w_blk_ref, b_blk_ref,
                       w_out_ref, b_out_ref, o_ref):
    mm_dtype = w_in_ref.dtype  # bf16

    # Input projection + ReLU (bf16 MXU inputs, f32 accumulation).
    h = jnp.dot(x_ref[...].astype(mm_dtype), w_in_ref[...],
                preferred_element_type=jnp.float32) + b_in_ref[...]
    h = jnp.maximum(h, 0.0)

    # Residual blocks: h = h + ReLU(h @ W_l + b_l).  Dropout(p=0) == identity.
    # Refs are indexed per block inside the (small, static) loop so live
    # ranges stay short and Mosaic overlaps the loads with MXU latency.
    nb = w_blk_ref.shape[0]
    for l in range(nb):
        y = jnp.dot(h.astype(mm_dtype), w_blk_ref[l],
                    preferred_element_type=jnp.float32) + b_blk_ref[l]
        h = h + jnp.maximum(y, 0.0)

    # Output projection at the true output width.
    out = jnp.dot(h.astype(mm_dtype), w_out_ref[...],
                  preferred_element_type=jnp.float32) + b_out_ref[...]
    o_ref[...] = out.astype(o_ref.dtype)


# ---------------------------------------------------------------------------
# Wrapper
# ---------------------------------------------------------------------------
def residual_fc_forward(x, kp, *, block_rows=4096):
    """x: (B, input_dim) f32.  kp: params from prepare_kernel_params."""
    B, in_dim = x.shape
    HP = kp["w_in"].shape[1]            # padded hidden width (128)
    NB = kp["w_blk"].shape[0]
    out_dim = kp["w_out"].shape[1]      # true output width (no padding)

    # Adaptive batch tile: split B into ~equal tiles of at most block_rows
    # rows, rounded up to a multiple of 8 sublanes.  No host-side padding of
    # x; the (at most 7-row) ragged tail of the last block is handled by
    # Pallas' masked OOB stores.
    nsteps = max(1, pl.cdiv(B, block_rows))
    tb = _round_up(pl.cdiv(B, nsteps), 8)
    grid = (pl.cdiv(B, tb),)

    weight_keys = ("w_in", "b_in", "w_blk", "b_blk", "w_out", "b_out")
    work_rows = grid[0] * tb
    flops = 2 * work_rows * (in_dim * HP + NB * HP * HP + HP * out_dim)
    bytes_accessed = (int(x.size) * x.dtype.itemsize
                      + B * out_dim * 4
                      + sum(int(kp[k].size) * kp[k].dtype.itemsize
                            for k in weight_keys))

    out = pl.pallas_call(
        residual_fc_kernel,
        out_shape=jax.ShapeDtypeStruct((B, out_dim), jnp.float32),
        grid=grid,
        in_specs=[
            # Activations: tiled over the batch grid (pipelined DMA).
            pl.BlockSpec((tb, in_dim), lambda i: (i, 0)),
            # Weights/biases: constant index_map -> DMA'd once, VMEM-resident.
            pl.BlockSpec((in_dim, HP), lambda i: (0, 0)),
            pl.BlockSpec((1, HP), lambda i: (0, 0)),
            pl.BlockSpec((NB, HP, HP), lambda i: (0, 0, 0)),
            pl.BlockSpec((NB, 1, HP), lambda i: (0, 0, 0)),
            pl.BlockSpec((HP, out_dim), lambda i: (0, 0)),
            pl.BlockSpec((1, out_dim), lambda i: (0, 0)),
        ],
        # True-width output block (== full array dim, so legal); halves the
        # output HBM writeback vs a 128-lane padded slab and needs no slicing.
        out_specs=pl.BlockSpec((tb, out_dim), lambda i: (i, 0)),
        compiler_params=pltpu.CompilerParams(
            dimension_semantics=("parallel",),
            vmem_limit_bytes=32 * 1024 * 1024),
        cost_estimate=pl.CostEstimate(flops=flops, transcendentals=0,
                                      bytes_accessed=bytes_accessed),
    )(x, kp["w_in"], kp["b_in"], kp["w_blk"], kp["b_blk"],
      kp["w_out"], kp["b_out"])
    return out


# ---------------------------------------------------------------------------
# Parameter construction
# ---------------------------------------------------------------------------
def init_raw_params(key, input_dim=64, output_dim=64, nb_residual_blocks=4,
                    hidden_state=64, dtype=jnp.float32):
    """f32 params in transposed (in, out) layout, nn.Linear-style init."""
    ks = jax.random.split(key, 6)

    def lin(kw, kb, fan_in, fan_out):
        bound = 1.0 / jnp.sqrt(jnp.asarray(fan_in, jnp.float32))
        w = jax.random.uniform(kw, (fan_in, fan_out), dtype, -bound, bound)
        b = jax.random.uniform(kb, (fan_out,), dtype, -bound, bound)
        return w, b

    w_in, b_in = lin(ks[0], ks[1], input_dim, hidden_state)
    w_out, b_out = lin(ks[2], ks[3], hidden_state, output_dim)

    kws = jax.random.split(ks[4], nb_residual_blocks)
    kbs = jax.random.split(ks[5], nb_residual_blocks)
    w_blk, b_blk = [], []
    for l in range(nb_residual_blocks):
        w, b = lin(kws[l], kbs[l], hidden_state, hidden_state)
        w_blk.append(w)
        b_blk.append(b)
    return {
        "w_in": w_in, "b_in": b_in,
        "w_blk": jnp.stack(w_blk),   # (NB, H, H)
        "b_blk": jnp.stack(b_blk),   # (NB, H)
        "w_out": w_out, "b_out": b_out,
    }


def prepare_kernel_params(raw, lane=LANE):
    """Zero-pad the hidden feature dim to the lane width and cast weights to
    bf16 (biases stay f32).  Zero padding is exact through ReLU + residual.
    The output dim is NOT padded (output block uses the true width)."""
    in_dim, hidden = raw["w_in"].shape
    out_dim = raw["w_out"].shape[1]
    nb = raw["w_blk"].shape[0]
    hp = _round_up(hidden, lane)

    w_in = jnp.pad(raw["w_in"], ((0, 0), (0, hp - hidden))).astype(jnp.bfloat16)
    b_in = jnp.pad(raw["b_in"], (0, hp - hidden)).reshape(1, hp)
    w_blk = jnp.pad(raw["w_blk"],
                    ((0, 0), (0, hp - hidden), (0, hp - hidden))
                    ).astype(jnp.bfloat16)
    b_blk = jnp.pad(raw["b_blk"], ((0, 0), (0, hp - hidden))).reshape(nb, 1, hp)
    w_out = jnp.pad(raw["w_out"], ((0, hp - hidden), (0, 0))).astype(jnp.bfloat16)
    b_out = raw["b_out"].reshape(1, out_dim)

    return {
        "w_in": w_in, "b_in": b_in,
        "w_blk": w_blk, "b_blk": b_blk,
        "w_out": w_out, "b_out": b_out,
    }


def residual_fc_ref(x, raw):
    """Pure-JAX f32 reference of the PyTorch forward."""
    h = jnp.maximum(x @ raw["w_in"] + raw["b_in"], 0.0)
    for l in range(raw["w_blk"].shape[0]):
        h = h + jnp.maximum(h @ raw["w_blk"][l] + raw["b_blk"][l], 0.0)
    return h @ raw["w_out"] + raw["b_out"]


# ---------------------------------------------------------------------------
# Demo / check
# ---------------------------------------------------------------------------
if __name__ == "__main__":
    key = jax.random.PRNGKey(0)
    k_x, k_x2, k_x3, k_p = jax.random.split(key, 4)

    INPUT_DIM, OUTPUT_DIM, HIDDEN, NB = 64, 64, 64, 4
    raw = init_raw_params(k_p, INPUT_DIM, OUTPUT_DIM, NB, HIDDEN)
    kp = prepare_kernel_params(raw)

    # Small batch: single grid step.
    B = 16
    x = jax.random.normal(k_x, (B, INPUT_DIM), jnp.float32)
    out = jax.block_until_ready(residual_fc_forward(x, kp))
    ref = residual_fc_ref(x, raw)
    assert out.shape == (B, OUTPUT_DIM)
    assert jnp.allclose(out, ref, atol=5e-2, rtol=5e-2)  # bf16-weight tolerance

    # Multi-step grid: weights stay VMEM-resident across 4 batch tiles.
    B2 = 1024
    x2 = jax.random.normal(k_x2, (B2, INPUT_DIM), jnp.float32)
    out2 = jax.block_until_ready(residual_fc_forward(x2, kp, block_rows=256))
    ref2 = residual_fc_ref(x2, raw)
    assert out2.shape == (B2, OUTPUT_DIM)
    assert jnp.allclose(out2, ref2, atol=5e-2, rtol=5e-2)

    # Ragged last block: B not a multiple of the tile -> masked OOB store,
    # no host-side padding or slicing.
    B3 = 777
    x3 = jax.random.normal(k_x3, (B3, INPUT_DIM), jnp.float32)
    out3 = jax.block_until_ready(residual_fc_forward(x3, kp, block_rows=256))
    ref3 = residual_fc_ref(x3, raw)
    assert out3.shape == (B3, OUTPUT_DIM)
    assert jnp.allclose(out3, ref3, atol=5e-2, rtol=5e-2)

    print("KERNEL_OK")
</pallas_src>

<mosaic_0001>
module attributes {stable_mosaic.version = 11 : i64} {
  func.func @residual_fc_kernel(%arg0: i32, %arg1: memref<16x64xf32, #tpu.memory_space<vmem>>, %arg2: memref<64x128xbf16, #tpu.memory_space<vmem>>, %arg3: memref<1x128xf32, #tpu.memory_space<vmem>>, %arg4: memref<4x128x128xbf16, #tpu.memory_space<vmem>>, %arg5: memref<4x1x128xf32, #tpu.memory_space<vmem>>, %arg6: memref<128x64xbf16, #tpu.memory_space<vmem>>, %arg7: memref<1x64xf32, #tpu.memory_space<vmem>>, %arg8: memref<16x64xf32, #tpu.memory_space<vmem>>) attributes {dimension_semantics = [#tpu.dimension_semantics<parallel>], iteration_bounds = array<i64: 1>, scalar_prefetch = 0 : i64, scratch_operands = 0 : i64, tpu.core_type = #tpu.core_type<tc>, window_params = [{transform_indices = @transform_0, window_bounds = array<i64: 16, 64>}, {pipeline_mode = #tpu.pipeline_mode<synchronous>, transform_indices = @transform_1, window_bounds = array<i64: 64, 128>}, {pipeline_mode = #tpu.pipeline_mode<synchronous>, transform_indices = @transform_2, window_bounds = array<i64: 1, 128>}, {pipeline_mode = #tpu.pipeline_mode<synchronous>, transform_indices = @transform_3, window_bounds = array<i64: 4, 128, 128>}, {pipeline_mode = #tpu.pipeline_mode<synchronous>, transform_indices = @transform_4, window_bounds = array<i64: 4, 1, 128>}, {pipeline_mode = #tpu.pipeline_mode<synchronous>, transform_indices = @transform_5, window_bounds = array<i64: 128, 64>}, {pipeline_mode = #tpu.pipeline_mode<synchronous>, transform_indices = @transform_6, window_bounds = array<i64: 1, 64>}, {transform_indices = @transform_7, window_bounds = array<i64: 16, 64>}]} {
    %c0 = arith.constant 0 : index
    %c0_0 = arith.constant 0 : index
    %0 = vector.load %arg1[%c0, %c0_0] : memref<16x64xf32, #tpu.memory_space<vmem>>, vector<16x64xf32>
    %1 = arith.truncf %0 : vector<16x64xf32> to vector<16x64xbf16>
    %c0_1 = arith.constant 0 : index
    %c0_2 = arith.constant 0 : index
    %2 = vector.load %arg2[%c0_1, %c0_2] : memref<64x128xbf16, #tpu.memory_space<vmem>>, vector<64x128xbf16>
    %cst = arith.constant dense<0.000000e+00> : vector<16x128xf32>
    %3 = tpu.matmul %1, %2, %cst {dimension_numbers = #tpu.dot_dimension_numbers<[1], [0], [0], [1], [0, 0, 1, 1], [], []>} : vector<16x64xbf16>, vector<64x128xbf16>, vector<16x128xf32> -> vector<16x128xf32>
    %c0_3 = arith.constant 0 : index
    %c0_4 = arith.constant 0 : index
    %4 = vector.load %arg3[%c0_3, %c0_4] : memref<1x128xf32, #tpu.memory_space<vmem>>, vector<1x128xf32>
    %5 = vector.broadcast %4 : vector<1x128xf32> to vector<16x128xf32>
    %6 = arith.addf %3, %5 : vector<16x128xf32>
    %cst_5 = arith.constant 0.000000e+00 : f32
    %7 = vector.broadcast %cst_5 : f32 to vector<16x128xf32>
    %8 = arith.maximumf %6, %7 : vector<16x128xf32>
    %9 = arith.truncf %8 : vector<16x128xf32> to vector<16x128xbf16>
    %c0_6 = arith.constant 0 : index
    %c0_7 = arith.constant 0 : index
    %c0_8 = arith.constant 0 : index
    %10 = vector.load %arg4[%c0_6, %c0_7, %c0_8] : memref<4x128x128xbf16, #tpu.memory_space<vmem>>, vector<1x128x128xbf16>
    %11 = vector.shape_cast %10 : vector<1x128x128xbf16> to vector<128x128xbf16>
    %cst_9 = arith.constant dense<0.000000e+00> : vector<16x128xf32>
    %12 = tpu.matmul %9, %11, %cst_9 {dimension_numbers = #tpu.dot_dimension_numbers<[1], [0], [0], [1], [0, 0, 1, 1], [], []>} : vector<16x128xbf16>, vector<128x128xbf16>, vector<16x128xf32> -> vector<16x128xf32>
    %c0_10 = arith.constant 0 : index
    %c0_11 = arith.constant 0 : index
    %c0_12 = arith.constant 0 : index
    %13 = vector.load %arg5[%c0_10, %c0_11, %c0_12] : memref<4x1x128xf32, #tpu.memory_space<vmem>>, vector<1x1x128xf32>
    %14 = vector.shape_cast %13 : vector<1x1x128xf32> to vector<1x128xf32>
    %15 = vector.broadcast %14 : vector<1x128xf32> to vector<16x128xf32>
    %16 = arith.addf %12, %15 : vector<16x128xf32>
    %cst_13 = arith.constant 0.000000e+00 : f32
    %17 = vector.broadcast %cst_13 : f32 to vector<16x128xf32>
    %18 = arith.maximumf %16, %17 : vector<16x128xf32>
    %19 = arith.addf %8, %18 : vector<16x128xf32>
    %20 = arith.truncf %19 : vector<16x128xf32> to vector<16x128xbf16>
    %c1 = arith.constant 1 : index
    %c0_14 = arith.constant 0 : index
    %c0_15 = arith.constant 0 : index
    %21 = vector.load %arg4[%c1, %c0_14, %c0_15] : memref<4x128x128xbf16, #tpu.memory_space<vmem>>, vector<1x128x128xbf16>
    %22 = vector.shape_cast %21 : vector<1x128x128xbf16> to vector<128x128xbf16>
    %cst_16 = arith.constant dense<0.000000e+00> : vector<16x128xf32>
    %23 = tpu.matmul %20, %22, %cst_16 {dimension_numbers = #tpu.dot_dimension_numbers<[1], [0], [0], [1], [0, 0, 1, 1], [], []>} : vector<16x128xbf16>, vector<128x128xbf16>, vector<16x128xf32> -> vector<16x128xf32>
    %c1_17 = arith.constant 1 : index
    %c0_18 = arith.constant 0 : index
    %c0_19 = arith.constant 0 : index
    %24 = vector.load %arg5[%c1_17, %c0_18, %c0_19] : memref<4x1x128xf32, #tpu.memory_space<vmem>>, vector<1x1x128xf32>
    %25 = vector.shape_cast %24 : vector<1x1x128xf32> to vector<1x128xf32>
    %26 = vector.broadcast %25 : vector<1x128xf32> to vector<16x128xf32>
    %27 = arith.addf %23, %26 : vector<16x128xf32>
    %cst_20 = arith.constant 0.000000e+00 : f32
    %28 = vector.broadcast %cst_20 : f32 to vector<16x128xf32>
    %29 = arith.maximumf %27, %28 : vector<16x128xf32>
    %30 = arith.addf %19, %29 : vector<16x128xf32>
    %31 = arith.truncf %30 : vector<16x128xf32> to vector<16x128xbf16>
    %c2 = arith.constant 2 : index
    %c0_21 = arith.constant 0 : index
    %c0_22 = arith.constant 0 : index
    %32 = vector.load %arg4[%c2, %c0_21, %c0_22] : memref<4x128x128xbf16, #tpu.memory_space<vmem>>, vector<1x128x128xbf16>
    %33 = vector.shape_cast %32 : vector<1x128x128xbf16> to vector<128x128xbf16>
    %cst_23 = arith.constant dense<0.000000e+00> : vector<16x128xf32>
    %34 = tpu.matmul %31, %33, %cst_23 {dimension_numbers = #tpu.dot_dimension_numbers<[1], [0], [0], [1], [0, 0, 1, 1], [], []>} : vector<16x128xbf16>, vector<128x128xbf16>, vector<16x128xf32> -> vector<16x128xf32>
    %c2_24 = arith.constant 2 : index
    %c0_25 = arith.constant 0 : index
    %c0_26 = arith.constant 0 : index
    %35 = vector.load %arg5[%c2_24, %c0_25, %c0_26] : memref<4x1x128xf32, #tpu.memory_space<vmem>>, vector<1x1x128xf32>
    %36 = vector.shape_cast %35 : vector<1x1x128xf32> to vector<1x128xf32>
    %37 = vector.broadcast %36 : vector<1x128xf32> to vector<16x128xf32>
    %38 = arith.addf %34, %37 : vector<16x128xf32>
    %cst_27 = arith.constant 0.000000e+00 : f32
    %39 = vector.broadcast %cst_27 : f32 to vector<16x128xf32>
    %40 = arith.maximumf %38, %39 : vector<16x128xf32>
    %41 = arith.addf %30, %40 : vector<16x128xf32>
    %42 = arith.truncf %41 : vector<16x128xf32> to vector<16x128xbf16>
    %c3 = arith.constant 3 : index
    %c0_28 = arith.constant 0 : index
    %c0_29 = arith.constant 0 : index
    %43 = vector.load %arg4[%c3, %c0_28, %c0_29] : memref<4x128x128xbf16, #tpu.memory_space<vmem>>, vector<1x128x128xbf16>
    %44 = vector.shape_cast %43 : vector<1x128x128xbf16> to vector<128x128xbf16>
    %cst_30 = arith.constant dense<0.000000e+00> : vector<16x128xf32>
    %45 = tpu.matmul %42, %44, %cst_30 {dimension_numbers = #tpu.dot_dimension_numbers<[1], [0], [0], [1], [0, 0, 1, 1], [], []>} : vector<16x128xbf16>, vector<128x128xbf16>, vector<16x128xf32> -> vector<16x128xf32>
    %c3_31 = arith.constant 3 : index
    %c0_32 = arith.constant 0 : index
    %c0_33 = arith.constant 0 : index
    %46 = vector.load %arg5[%c3_31, %c0_32, %c0_33] : memref<4x1x128xf32, #tpu.memory_space<vmem>>, vector<1x1x128xf32>
    %47 = vector.shape_cast %46 : vector<1x1x128xf32> to vector<1x128xf32>
    %48 = vector.broadcast %47 : vector<1x128xf32> to vector<16x128xf32>
    %49 = arith.addf %45, %48 : vector<16x128xf32>
    %cst_34 = arith.constant 0.000000e+00 : f32
    %50 = vector.broadcast %cst_34 : f32 to vector<16x128xf32>
    %51 = arith.maximumf %49, %50 : vector<16x128xf32>
    %52 = arith.addf %41, %51 : vector<16x128xf32>
    %53 = arith.truncf %52 : vector<16x128xf32> to vector<16x128xbf16>
    %c0_35 = arith.constant 0 : index
    %c0_36 = arith.constant 0 : index
    %54 = vector.load %arg6[%c0_35, %c0_36] : memref<128x64xbf16, #tpu.memory_space<vmem>>, vector<128x64xbf16>
    %cst_37 = arith.constant dense<0.000000e+00> : vector<16x64xf32>
    %55 = tpu.matmul %53, %54, %cst_37 {dimension_numbers = #tpu.dot_dimension_numbers<[1], [0], [0], [1], [0, 0, 1, 1], [], []>} : vector<16x128xbf16>, vector<128x64xbf16>, vector<16x64xf32> -> vector<16x64xf32>
    %c0_38 = arith.constant 0 : index
    %c0_39 = arith.constant 0 : index
    %56 = vector.load %arg7[%c0_38, %c0_39] : memref<1x64xf32, #tpu.memory_space<vmem>>, vector<1x64xf32>
    %57 = vector.broadcast %56 : vector<1x64xf32> to vector<16x64xf32>
    %58 = arith.addf %55, %57 : vector<16x64xf32>
    %c0_40 = arith.constant 0 : index
    %c0_41 = arith.constant 0 : index
    %59 = vector.load %arg8[%c0_40, %c0_41] : memref<16x64xf32, #tpu.memory_space<vmem>>, vector<16x64xf32>
    tpu.vector_store %arg8[%c0_40, %c0_41], %58 {strides = array<i32>} : memref<16x64xf32, #tpu.memory_space<vmem>>, vector<16x64xf32>,
    return
  }
  func.func @transform_0(%arg0: i32) -> (i32, i32) {
    %c0_i32 = arith.constant 0 : i32
    %c0_i32_0 = arith.constant 0 : i32
    return %arg0, %c0_i32 : i32, i32
  }
  func.func @transform_1(%arg0: i32) -> (i32, i32) {
    %c0_i32 = arith.constant 0 : i32
    %c0_i32_0 = arith.constant 0 : i32
    %c0_i32_1 = arith.constant 0 : i32
    return %c0_i32, %c0_i32_0 : i32, i32
  }
  func.func @transform_2(%arg0: i32) -> (i32, i32) {
    %c0_i32 = arith.constant 0 : i32
    %c0_i32_0 = arith.constant 0 : i32
    %c0_i32_1 = arith.constant 0 : i32
    return %c0_i32, %c0_i32_0 : i32, i32
  }
  func.func @transform_3(%arg0: i32) -> (i32, i32, i32) {
    %c0_i32 = arith.constant 0 : i32
    %c0_i32_0 = arith.constant 0 : i32
    %c0_i32_1 = arith.constant 0 : i32
    %c0_i32_2 = arith.constant 0 : i32
    return %c0_i32, %c0_i32_0, %c0_i32_1 : i32, i32, i32
  }
  func.func @transform_4(%arg0: i32) -> (i32, i32, i32) {
    %c0_i32 = arith.constant 0 : i32
    %c0_i32_0 = arith.constant 0 : i32
    %c0_i32_1 = arith.constant 0 : i32
    %c0_i32_2 = arith.constant 0 : i32
    return %c0_i32, %c0_i32_0, %c0_i32_1 : i32, i32, i32
  }
  func.func @transform_5(%arg0: i32) -> (i32, i32) {
    %c0_i32 = arith.constant 0 : i32
    %c0_i32_0 = arith.constant 0 : i32
    %c0_i32_1 = arith.constant 0 : i32
    return %c0_i32, %c0_i32_0 : i32, i32
  }
  func.func @transform_6(%arg0: i32) -> (i32, i32) {
    %c0_i32 = arith.constant 0 : i32
    %c0_i32_0 = arith.constant 0 : i32
    %c0_i32_1 = arith.constant 0 : i32
    return %c0_i32, %c0_i32_0 : i32, i32
  }
  func.func @transform_7(%arg0: i32) -> (i32, i32) {
    %c0_i32 = arith.constant 0 : i32
    %c0_i32_0 = arith.constant 0 : i32
    return %arg0, %c0_i32 : i32, i32
  }
}

</mosaic_0001>

<bundles_post_ra>
// kernel: tpu_custom_call.1
= control target key start
LH: loop header
LB: loop body
LE: loop exit
PB: predicated region body
PF: predicated region fallthrough
CT: control target
= control target key end

     0   :  { %12 = vsyncpa [#allocation3], 0  ;;  %s1244_s0 = inlined_call_operand.vmem [shape: f32[16,64], index: 0, kind: input, shape index: {}]   ;;  %s1245_s1 = inlined_call_operand.vmem [shape: bf16[64,128], index: 1, kind: input, shape index: {}]   ;;  %s1246_s2 = inlined_call_operand.vmem [shape: f32[1,128], index: 2, kind: input, shape index: {}]   ;;  %s1247_s3 = inlined_call_operand.hbm [shape: bf16[4,128,128], index: 3, kind: input, shape index: {}]   ;;  %s1248_s4 = inlined_call_operand.vmem [shape: f32[4,1,128], index: 4, kind: input, shape index: {}]   ;;  %s1249_s5 = inlined_call_operand.vmem [shape: bf16[128,64], index: 5, kind: input, shape index: {}]   ;;  %s1250_s6 = inlined_call_operand.vmem [shape: f32[1,64], index: 6, kind: input, shape index: {}]   ;;  %s1251_s7 = inlined_call_operand.hbm [shape: f32[16,64], index: 7, kind: output, shape index: {}]  }
   0x1   :  { %13 = vsyncpa [#allocation4], 0  ;;  %s1053_s24 = smov [#allocation2]   ;;  %s1005_s28 = scalar_lea.hbm %s1247_s3, 4096 }
   0x2   :  { %s25_s25 = sshll.u32 %s1053_s24, 4  ;;  %p1006_p0 = scmp.ne.s32.totalorder %s1247_s3, %s1005_s28  ;;  %s26_s25 = int_to_ptr.vmem [resolvable:$true] %s25_s25 }
   0x3   :  { %p1009_p1 = scmp.lt.u32.totalorder %s1005_s28, %s1247_s3 }
   0x5   :  { %p1011_p2 = pnand %p1009_p1, %p1006_p0 }
   0x7   :  { %1014 = shalt.err (!%p1011_p2)
}
   0x8   :  { %s1015_s10 = scalar_lea.vmem %s26_s25, 4096  ;;  %p1020_p4 = scmp.lt.s32.totalorder %s26_s25, %s26_s25 }
   0x9   :  { %p1016_p3 = scmp.ne.s32.totalorder %s26_s25, %s1015_s10  ;;  %p1021_p5 = scmp.lt.s32.totalorder %s1015_s10, %s1015_s10 }
   0xb   :  { %p1022_p6 = por %p1021_p5, %p1020_p4 }
   0xd   :  { %p1023_p7 = pnand %p1022_p6, %p1016_p3 }
   0xf   :  { %1026 = shalt.err (!%p1023_p7)
}
  0x10   :  { %s1054_s11 = smov 64   ;;  %s1055_s12 = smov 4  }
  0x11   :  { %31 = dma.hbm_to_vmem [thread:$0]  %s1247_s3, 4096, %s26_s25, [#allocation3], %s1054_s11, %s1054_s11, %s1055_s12  }
  0x12   :  { %1049 = dma.done.wait [#allocation3], 4096  }
  0x13   :  { %1050 = vsyncadd [#allocation3], 4294963200  ;;  %v1056_v0 = vmov 0.0   ;;  %vm1057_vm0 = vmmov 0   ;;  %v961_v1 = vld [vmem:[%s1245_s1] sm:$0xff]   ;;  %v962_v2 = vld [vmem:[%s1245_s1 + $0x8] sm:$0xff]  }
  0x14   :  { %841 = vmatprep.subr.bf16.mxu0 %v1056_v0  ;;  %849 = vmatprep.mubr.msk.bf16.mxu0 %vm1057_vm0, %v1056_v0  ;;  %v965_v3 = vld [vmem:[#allocation2] sm:$0xff]   ;;  %v963_v4 = vld [vmem:[%s1245_s1 + $0x10] sm:$0xff]   ;;  %v966_v5 = vld [vmem:[#allocation2 + $0x8] sm:$0xff]   ;;  %vm84_vm1 = vcmask 523264  }
  0x15   :  { %853 = vmatprep.subr.bf16.mxu1 %v1056_v0  ;;  %869 = vmatprep.mubr.msk.bf16.mxu1 %vm1057_vm0, %v1056_v0  ;;  %v964_v6 = vld [vmem:[%s1245_s1 + $0x18] sm:$0xff]   ;;  %v42_v7 = vld [vmem:[%s1244_s0] sm:$0xff]  ;;  %v43_v8 = vld [vmem:[%s1244_s0 + $0x8] sm:$0xff] }
  0x16   :  { %842 = vmatpush3.bf16.msra.mxu0 %v961_v1  ;;  %854 = vmatpush3.bf16.msra.mxu1 %v965_v3  ;;  %v967_v9 = vld [vmem:[#allocation2 + $0x10] sm:$0xff]   ;;  %v44_v10 = vpack.c.bf16 %v43_v8, %v42_v7  ;;  %v968_v11 = vld [vmem:[#allocation2 + $0x18] sm:$0xff]   ;;  %v969_v12 = vld [vmem:[#allocation2 + $0x20] sm:$0xff]  }
  0x17   :  { %843 = vmatprep.subr.bf16.mxu0 %v1056_v0  ;;  %855 = vmatprep.subr.bf16.mxu1 %v1056_v0  ;;  %v970_v13 = vld [vmem:[#allocation2 + $0x28] sm:$0xff]   ;;  %v971_v14 = vld [vmem:[#allocation2 + $0x30] sm:$0xff]   ;;  %v972_v15 = vld [vmem:[#allocation2 + $0x38] sm:$0xff]  }
  0x18   :  { %v973_v16 = vld [vmem:[#allocation2 + $0x40] sm:$0xff]   ;;  %v974_v17 = vld [vmem:[#allocation2 + $0x48] sm:$0xff]   ;;  %v975_v18 = vld [vmem:[#allocation2 + $0x50] sm:$0xff]  }
  0x19   :  { %v976_v19 = vld [vmem:[#allocation2 + $0x58] sm:$0xff]   ;;  %v977_v20 = vld [vmem:[#allocation2 + $0x60] sm:$0xff]   ;;  %v978_v31 = vld [vmem:[#allocation2 + $0x68] sm:$0xff]  }
  0x1a   :  { %844 = vmatpush3.bf16.msra.mxu0 %v962_v2  ;;  %856 = vmatpush3.bf16.msra.mxu1 %v966_v5  ;;  %v737_v21 = vld [vmem:[%s1246_s2] ss:$0 sm:$0xff]  ;;  %v979_v32 = vld [vmem:[#allocation2 + $0x70] sm:$0xff]   ;;  %v980_v33 = vld [vmem:[#allocation2 + $0x78] sm:$0xff]  }
  0x1b   :  { %845 = vmatprep.subr.bf16.mxu0 %v1056_v0  ;;  %857 = vmatprep.subr.bf16.mxu1 %v1056_v0  ;;  %v981_v34 = vld [vmem:[#allocation2 + $0x80] sm:$0xff]   ;;  %v982_v35 = vld [vmem:[#allocation2 + $0x88] sm:$0xff]   ;;  %v983_v36 = vld [vmem:[#allocation2 + $0x90] sm:$0xff]  }
  0x1c   :  { %v984_v37 = vld [vmem:[#allocation2 + $0x98] sm:$0xff]   ;;  %v985_v38 = vld [vmem:[#allocation2 + $0xa0] sm:$0xff]   ;;  %v986_v51 = vld [vmem:[#allocation2 + $0xa8] sm:$0xff]  }
  0x1d   :  { %v743_v39 = vld [vmem:[%s1248_s4] ss:$0 sm:$0xff]  ;;  %v987_v52 = vld [vmem:[#allocation2 + $0xb0] sm:$0xff]   ;;  %v988_v53 = vld [vmem:[#allocation2 + $0xb8] sm:$0xff]  }
  0x1e   :  { %846 = vmatpush3.bf16.msra.mxu0 %v963_v4  ;;  %858 = vmatpush3.bf16.msra.mxu1 %v967_v9  ;;  %v989_v54 = vld [vmem:[#allocation2 + $0xc0] sm:$0xff]   ;;  %v990_v55 = vld [vmem:[#allocation2 + $0xc8] sm:$0xff]   ;;  %v991_v56 = vld [vmem:[#allocation2 + $0xd0] sm:$0xff]  }
  0x1f   :  { %847 = vmatprep.subr.bf16.mxu0 %v1056_v0  ;;  %859 = vmatprep.subr.bf16.mxu1 %v1056_v0  ;;  %v992_v57 = vld [vmem:[#allocation2 + $0xd8] sm:$0xff]   ;;  %v993_v58 = vld [vmem:[#allocation2 + $0xe0] sm:$0xff]   ;;  %v994_v8 = vld [vmem:[#allocation2 + $0xe8] sm:$0xff]  }
  0x20   :  { %v753_v59 = vld [vmem:[%s1248_s4 + $0x1] ss:$0 sm:$0xff]  ;;  %v995_v9 = vld [vmem:[#allocation2 + $0xf0] sm:$0xff]  }
  0x22   :  { %848 = vmatpush3.bf16.msra.mxu0 %v964_v6  ;;  %860 = vmatpush3.bf16.msra.mxu1 %v968_v11  ;;  %v997_v11 = vld [vmem:[%s1249_s5] sm:$0xff]  }
  0x23   :  { %873 = vmatprep.subr.bf16.mxu0 %v1056_v0  ;;  %861 = vmatprep.subr.bf16.mxu1 %v1056_v0 }
  0x25   :  { %850 = vmatmul.mubr.msk.bf16.vlgmr.msra.gmra.mrb[0].mxu0 %vm84_vm1, %v44_v10  ;;  %v996_v10 = vld [vmem:[#allocation2 + $0xf8] sm:$0xff]  }
  0x26   :  { %889 = vmatprep.mubr.msk.bf16.mxu0 %vm1057_vm0, %v1056_v0  ;;  %862 = vmatpush3.bf16.msra.mxu1 %v969_v12  ;;  %v998_v12 = vld [vmem:[%s1249_s5 + $0x8] sm:$0xff]  }
  0x27   :  { %863 = vmatprep.subr.bf16.mxu1 %v1056_v0  ;;  %874 = vmatpush3.bf16.msra.mxu0 %v973_v16  ;;  %v763_v16 = vld [vmem:[%s1248_s4 + $0x2] ss:$0 sm:$0xff] }
  0x28   :  { %875 = vmatprep.subr.bf16.mxu0 %v1056_v0 }
  0x2a   :  { %864 = vmatpush3.bf16.msra.mxu1 %v970_v13  ;;  %v999_v13 = vld [vmem:[%s1249_s5 + $0x10] sm:$0xff]  }
  0x2b   :  { %865 = vmatprep.subr.bf16.mxu1 %v1056_v0  ;;  %876 = vmatpush3.bf16.msra.mxu0 %v974_v17 }
  0x2c   :  { %877 = vmatprep.subr.bf16.mxu0 %v1056_v0 }
  0x2e   :  { %866 = vmatpush3.bf16.msra.mxu1 %v971_v14  ;;  %v1000_v14 = vld [vmem:[%s1249_s5 + $0x18] sm:$0xff]  }
  0x2f   :  { %867 = vmatprep.subr.bf16.mxu1 %v1056_v0  ;;  %878 = vmatpush3.bf16.msra.mxu0 %v975_v18 }
  0x30   :  { %879 = vmatprep.subr.bf16.mxu0 %v1056_v0 }
  0x32   :  { %868 = vmatpush3.bf16.msra.mxu1 %v972_v15  ;;  %v1001_v15 = vld [vmem:[%s1249_s5 + $0x20] sm:$0xff]  }
  0x33   :  { %893 = vmatprep.subr.bf16.mxu1 %v1056_v0  ;;  %880 = vmatpush3.bf16.msra.mxu0 %v976_v19 }
  0x34   :  { %881 = vmatprep.subr.bf16.mxu0 %v1056_v0 }
  0x37   :  { %882 = vmatpush3.bf16.msra.mxu0 %v977_v20 }
  0x38   :  { %883 = vmatprep.subr.bf16.mxu0 %v1056_v0 }
  0x3b   :  { %884 = vmatpush3.bf16.msra.mxu0 %v978_v31  ;;  %v773_v31 = vld [vmem:[%s1248_s4 + $0x3] ss:$0 sm:$0xff] }
  0x3c   :  { %885 = vmatprep.subr.bf16.mxu0 %v1056_v0 }
  0x3f   :  { %886 = vmatpush3.bf16.msra.mxu0 %v979_v32 }
  0x40   :  { %887 = vmatprep.subr.bf16.mxu0 %v1056_v0 }
  0x43   :  { %888 = vmatpush3.bf16.msra.mxu0 %v980_v33 }
  0x44   :  { %913 = vmatprep.subr.bf16.mxu0 %v1056_v0 }
  0xf8   :  { %v122_v22 = vpop.f32.mrb[0].mxu0 }
  0xf9   :  { %v123_v23 = vadd.f32 %v737_v21, %v122_v22  ;;  %v851_v24 = vpop.f32.mrb[1].mxu0 }
  0xfa   :  { %v125_v25 = vpop.f32.mrb[2].mxu0 }
  0xfb   :  { %v126_v26 = vadd.f32 %v737_v21, %v125_v25  ;;  %v852_v27 = vpop.f32.mrb[3].mxu0  ;;  %v129_v28 = vmax.f32 %v123_v23, 0.0 }
  0xfd   :  { %v130_v29 = vmax.f32 %v126_v26, 0.0 }
  0xff   :  { %v131_v30 = vpack.c.bf16 %v130_v29, %v129_v28 }
 0x101   :  { %870 = vmatmul.mubr.bf16.vlgmr.msra.gmra.mrb[0].mxu1 %v131_v30  ;;  %v1004_v30 = vld [vmem:[%s1249_s5 + $0x38] sm:$0xff]  }
 0x102   :  { %909 = vmatprep.mubr.msk.bf16.mxu1 %vm1057_vm0, %v1056_v0  ;;  %894 = vmatpush3.bf16.msra.mxu1 %v981_v34 }
 0x103   :  { %895 = vmatprep.subr.bf16.mxu1 %v1056_v0 }
 0x106   :  { %896 = vmatpush3.bf16.msra.mxu1 %v982_v35 }
 0x107   :  { %897 = vmatprep.subr.bf16.mxu1 %v1056_v0 }
 0x10a   :  { %898 = vmatpush3.bf16.msra.mxu1 %v983_v36 }
 0x10b   :  { %899 = vmatprep.subr.bf16.mxu1 %v1056_v0 }
 0x10e   :  { %900 = vmatpush3.bf16.msra.mxu1 %v984_v37 }
 0x10f   :  { %901 = vmatprep.subr.bf16.mxu1 %v1056_v0 }
 0x112   :  { %902 = vmatpush3.bf16.msra.mxu1 %v985_v38 }
 0x113   :  { %903 = vmatprep.subr.bf16.mxu1 %v1056_v0 }
 0x116   :  { %904 = vmatpush3.bf16.msra.mxu1 %v986_v51 }
 0x117   :  { %905 = vmatprep.subr.bf16.mxu1 %v1056_v0 }
 0x11a   :  { %906 = vmatpush3.bf16.msra.mxu1 %v987_v52 }
 0x11b   :  { %907 = vmatprep.subr.bf16.mxu1 %v1056_v0 }
 0x11e   :  { %908 = vmatpush3.bf16.msra.mxu1 %v988_v53 }
 0x11f   :  { %933 = vmatprep.subr.bf16.mxu1 %v1056_v0 }
 0x1d4   :  { %v237_v40 = vpop.f32.mrb[0].mxu1 }
 0x1d5   :  { %v238_v41 = vadd.f32 %v743_v39, %v237_v40  ;;  %v871_v42 = vpop.f32.mrb[1].mxu1 }
 0x1d6   :  { %v240_v43 = vpop.f32.mrb[2].mxu1  ;;  %v782_v42 = vld [vmem:[%s1250_s6] ss:$0 sm:$0xff] }
 0x1d7   :  { %v244_v44 = vmax.f32 %v238_v41, 0.0  ;;  %v241_v45 = vadd.f32 %v743_v39, %v240_v43  ;;  %v872_v46 = vpop.f32.mrb[3].mxu1 }
 0x1d9   :  { %v245_v47 = vmax.f32 %v241_v45, 0.0  ;;  %v246_v48 = vadd.f32 %v244_v44, %v129_v28  ;;  %v1002_v28 = vld [vmem:[%s1249_s5 + $0x28] sm:$0xff]  }
 0x1db   :  { %v247_v49 = vadd.f32 %v245_v47, %v130_v29  ;;  %v1003_v29 = vld [vmem:[%s1249_s5 + $0x30] sm:$0xff]   ;;  %s1058_s5 = smov [#allocation5]  }
 0x1dc   :  { %s725_s1 = sshll.u32 %s1058_s5, 4  ;;  %s726_s1 = int_to_ptr.vmem [resolvable:$true] %s725_s1 }
 0x1dd   :  { %v248_v50 = vpack.c.bf16 %v247_v49, %v246_v48  ;;  %s1027_s4 = scalar_lea.vmem %s726_s1, 256  ;;  %p1032_p9 = scmp.lt.s32.totalorder %s726_s1, %s726_s1 }
 0x1de   :  { %p1028_p8 = scmp.ne.s32.totalorder %s726_s1, %s1027_s4  ;;  %p1033_p10 = scmp.lt.s32.totalorder %s1027_s4, %s1027_s4 }
 0x1df   :  { %890 = vmatmul.mubr.bf16.vlgmr.msra.gmra.mrb[4].mxu0 %v248_v50 }
 0x1e0   :  { %929 = vmatprep.mubr.msk.bf16.mxu0 %vm1057_vm0, %v1056_v0  ;;  %914 = vmatpush3.bf16.msra.mxu0 %v989_v54  ;;  %p1034_p11 = por %p1033_p10, %p1032_p9 }
 0x1e1   :  { %915 = vmatprep.subr.bf16.mxu0 %v1056_v0 }
 0x1e2   :  { %p1035_p12 = pnand %p1034_p11, %p1028_p8 }
 0x1e4   :  { %916 = vmatpush3.bf16.msra.mxu0 %v990_v55 }
 0x1e5   :  { %917 = vmatprep.subr.bf16.mxu0 %v1056_v0 }
 0x1e8   :  { %918 = vmatpush3.bf16.msra.mxu0 %v991_v56 }
 0x1e9   :  { %919 = vmatprep.subr.bf16.mxu0 %v1056_v0 }
 0x1ec   :  { %920 = vmatpush3.bf16.msra.mxu0 %v992_v57 }
 0x1ed   :  { %921 = vmatprep.subr.bf16.mxu0 %v1056_v0 }
 0x1f0   :  { %922 = vmatpush3.bf16.msra.mxu0 %v993_v58 }
 0x1f1   :  { %923 = vmatprep.subr.bf16.mxu0 %v1056_v0 }
 0x1f4   :  { %924 = vmatpush3.bf16.msra.mxu0 %v994_v8 }
 0x1f5   :  { %925 = vmatprep.subr.bf16.mxu0 %v1056_v0 }
 0x1f8   :  { %926 = vmatpush3.bf16.msra.mxu0 %v995_v9 }
 0x1f9   :  { %927 = vmatprep.subr.bf16.mxu0 %v1056_v0 }
 0x1fc   :  { %928 = vmatpush3.bf16.msra.mxu0 %v996_v10 }
 0x2b2   :  { %v356_v60 = vpop.f32.mrb[4].mxu0 }
 0x2b3   :  { %v357_v61 = vadd.f32 %v753_v59, %v356_v60  ;;  %v891_v62 = vpop.f32.mrb[5].mxu0 }
 0x2b4   :  { %v359_v63 = vpop.f32.mrb[6].mxu0 }
 0x2b5   :  { %v363_v1 = vmax.f32 %v357_v61, 0.0  ;;  %v360_v2 = vadd.f32 %v753_v59, %v359_v63  ;;  %v892_v3 = vpop.f32.mrb[7].mxu0 }
 0x2b7   :  { %v364_v4 = vmax.f32 %v360_v2, 0.0  ;;  %v365_v5 = vadd.f32 %v363_v1, %v246_v48 }
 0x2b9   :  { %v366_v6 = vadd.f32 %v364_v4, %v247_v49 }
 0x2bb   :  { %v367_v7 = vpack.c.bf16 %v366_v6, %v365_v5 }
 0x2bd   :  { %910 = vmatmul.mubr.bf16.vlgmr.msra.gmra.mrb[4].mxu1 %v367_v7 }
 0x2be   :  { %949 = vmatprep.mubr.msk.bf16.mxu1 %vm1057_vm0, %v1056_v0  ;;  %934 = vmatpush3.bf16.msra.mxu1 %v997_v11 }
 0x2bf   :  { %935 = vmatprep.subr.bf16.mxu1 %v1056_v0 }
 0x2c2   :  { %936 = vmatpush3.bf16.msra.mxu1 %v998_v12 }
 0x2c3   :  { %937 = vmatprep.subr.bf16.mxu1 %v1056_v0 }
 0x2c6   :  { %938 = vmatpush3.bf16.msra.mxu1 %v999_v13 }
 0x2c7   :  { %939 = vmatprep.subr.bf16.mxu1 %v1056_v0 }
 0x2ca   :  { %940 = vmatpush3.bf16.msra.mxu1 %v1000_v14 }
 0x2cb   :  { %941 = vmatprep.subr.bf16.mxu1 %v1056_v0 }
 0x2ce   :  { %942 = vmatpush3.bf16.msra.mxu1 %v1001_v15 }
 0x2cf   :  { %943 = vmatprep.subr.bf16.mxu1 %v1056_v0 }
 0x2d2   :  { %944 = vmatpush3.bf16.msra.mxu1 %v1002_v28 }
 0x2d3   :  { %945 = vmatprep.subr.bf16.mxu1 %v1056_v0 }
 0x2d6   :  { %946 = vmatpush3.bf16.msra.mxu1 %v1003_v29 }
 0x2d7   :  { %947 = vmatprep.subr.bf16.mxu1 %v1056_v0 }
 0x2da   :  { %948 = vmatpush3.bf16.msra.mxu1 %v1004_v30 }
 0x390   :  { %v475_v17 = vpop.f32.mrb[4].mxu1 }
 0x391   :  { %v476_v18 = vadd.f32 %v763_v16, %v475_v17  ;;  %v911_v19 = vpop.f32.mrb[5].mxu1 }
 0x392   :  { %v478_v20 = vpop.f32.mrb[6].mxu1 }
 0x393   :  { %v482_v21 = vmax.f32 %v476_v18, 0.0  ;;  %v479_v22 = vadd.f32 %v763_v16, %v478_v20  ;;  %v912_v23 = vpop.f32.mrb[7].mxu1 }
 0x395   :  { %v483_v24 = vmax.f32 %v479_v22, 0.0  ;;  %v484_v25 = vadd.f32 %v482_v21, %v365_v5 }
 0x397   :  { %v485_v26 = vadd.f32 %v483_v24, %v366_v6 }
 0x399   :  { %v486_v27 = vpack.c.bf16 %v485_v26, %v484_v25 }
 0x39b   :  { %930 = vmatmul.mubr.bf16.vlgmr.msra.gmra.mrb[8].mxu0 %v486_v27 }
 0x46e   :  { %v594_v32 = vpop.f32.mrb[8].mxu0 }
 0x46f   :  { %v595_v33 = vadd.f32 %v773_v31, %v594_v32  ;;  %v931_v34 = vpop.f32.mrb[9].mxu0 }
 0x470   :  { %v597_v35 = vpop.f32.mrb[10].mxu0 }
 0x471   :  { %v601_v36 = vmax.f32 %v595_v33, 0.0  ;;  %v598_v37 = vadd.f32 %v773_v31, %v597_v35  ;;  %v932_v38 = vpop.f32.mrb[11].mxu0 }
 0x473   :  { %v602_v39 = vmax.f32 %v598_v37, 0.0  ;;  %v603_v40 = vadd.f32 %v601_v36, %v484_v25 }
 0x475   :  { %v604_v41 = vadd.f32 %v602_v39, %v485_v26 }
 0x477   :  { %v605_v0 = vpack.c.bf16 %v604_v41, %v603_v40 }
 0x479   :  { %950 = vmatmul.mubr.bf16.vlgmr.msra.gmra.mrb[8].mxu1 %v605_v0 }
 0x54c   :  { %v711_v43 = vpop.f32.mrb[8].mxu1 }
 0x54d   :  { %v712_v44 = vadd.f32 %v782_v42, %v711_v43  ;;  %v951_v45 = vpop.f32.mrb[9].mxu1 }
 0x54e   :  { %v714_v46 = vpop.f32.mrb[10].mxu1 }
 0x54f   :  { %718 = vst.msk [vmem:[#allocation5] sm:$0xff] %vm84_vm1, %v712_v44  ;;  %v715_v47 = vadd.f32 %v782_v42, %v714_v46  ;;  %v952_v48 = vpop.f32.mrb[11].mxu1 }
 0x551   :  { %719 = vst.msk [vmem:[#allocation5 + $0x8] sm:$0xff] %vm84_vm1, %v715_v47 }
 0x552   :  { %1038 = shalt.err (!%p1035_p12)
}
 0x553   :  { %s1039_s26 = scalar_lea.hbm %s1251_s7, 256 }
 0x554   :  { %p1040_p13 = scmp.ne.s32.totalorder %s1251_s7, %s1039_s26  ;;  %p1043_p0 = scmp.lt.u32.totalorder %s1039_s26, %s1251_s7 }
 0x556   :  { %p1045_p1 = pnand %p1043_p0, %p1040_p13 }
 0x558   :  { %1048 = shalt.err (!%p1045_p1)
}
 0x559   :  { %s1059_s8 = smov 128   ;;  %s1060_s9 = smov 8  }
 0x55a   :  { %731 = dma.vmem_to_hbm [thread:$0]  %s726_s1, 256, %s1251_s7, [#allocation4], %s1059_s8, %s1059_s8, %s1060_s9  }
 0x55b   :  { %1051 = dma.done.wait [#allocation4], 256  }
 0x55c   :  { %1052 = vsyncadd [#allocation4], 4294967040 }
 0x55d   :  { %735 = vsyncpa [#allocation3], 1 }
 0x55e   :  { %736 = vsyncpa [#allocation4], 1 }

</bundles_post_ra>
